<compile_context>
chip_gen: v6e
topology: v6e:2x2x1
jax: 0.10.0
libtpu: 0.0.40
codegen_flags: <defaults>
</compile_context>

<pallas_src>
import jax
import jax.numpy as jnp
from jax.experimental import pallas as pl
from jax.experimental.pallas import tpu as pltpu


def lazy_layer_kernel(w_ref, x_ref, p_ref, o_ref):
    # 2-way softmax over axis 0 of the weights tile == exact, stable sigmoid.
    w = w_ref[...].astype(jnp.float32)                    # (2, tn)
    d = w[0:1, :] - w[1:2, :]                             # (1, tn)
    s0 = pl.reciprocal(1.0 + jnp.exp(-d), approx=False)   # (1, tn), EUP slot is free

    # Blend in f32 regardless of input dtype; cast only on the store.
    x = x_ref[...].astype(jnp.float32)                    # (tb, tn)
    p = p_ref[...].astype(jnp.float32)                    # (tb, tn)
    # out = s0*x + (1-s0)*p  ==  p + s0*(x - p)
    o_ref[...] = (p + s0 * (x - p)).astype(o_ref.dtype)


def _round_down(v, m):
    return (v // m) * m


def _round_up(v, m):
    return ((v + m - 1) // m) * m


def _vmem_plan():
    """Return (per-stream tile byte budget, scoped-VMEM limit), generation aware."""
    try:
        cap = pltpu.get_tpu_info().vmem_capacity_bytes
    except Exception:
        cap = None
    if cap is not None and cap >= (96 << 20):
        # v5e / v6e: 128 MiB physical VMEM -> bigger tiles, raised scoped limit.
        return 8 << 20, 96 << 20
    # v7x (64 MiB physical per TC) or unknown chip: stay conservative.
    return 4 << 20, 44 << 20


def _pick_tiles(B, n, itemsize, budget_bytes):
    """Pick (tb, tn) with tb*tn*itemsize <= budget, lane-dense tn, packed tb."""
    sub = max(8, 32 // itemsize)            # sublane packing: 8 f32, 16 bf16, 32 i8/fp8
    budget_elems = max(sub * 128, budget_bytes // itemsize)

    if B * n <= budget_elems:
        tb, tn = B, n
    else:
        # Widen channels first (keeps output stores lane-dense / unmasked vst),
        # then fill the batch dimension up to the byte budget.
        tb_floor = B if B <= sub else sub
        tn = min(n, max(128, _round_down(budget_elems // tb_floor, 128)))
        if tn < n:
            tn = _round_down(tn, 128)       # non-full lane tile must be 128-multiple
        tb = min(B, budget_elems // tn)
        if tb < B:
            tb = max(sub, _round_down(tb, sub))

    # Guarantee >= 2 grid steps so both v7x TensorCores get work
    # (negligible cost on single-TC v5e/v6e at sizes this small).
    if pl.cdiv(B, tb) * pl.cdiv(n, tn) < 2:
        if n >= 256:
            tn = _round_down(_round_up((n + 1) // 2, 128), 128)
        elif B >= 2 * sub:
            tb = _round_down((B + 1) // 2, sub)
    return tb, tn


def lazy_layer(x, propagated, weights, *, tb=None, tn=None):
    """x, propagated: (B, n); weights: (2, n). Returns (B, n) in x.dtype."""
    B, n = x.shape
    assert propagated.shape == (B, n)
    assert weights.shape == (2, n)

    itemsize = jnp.dtype(x.dtype).itemsize
    budget, vmem_limit = _vmem_plan()
    if tb is None or tn is None:
        auto_tb, auto_tn = _pick_tiles(B, n, itemsize, budget)
        tb = auto_tb if tb is None else tb
        tn = auto_tn if tn is None else tn

    grid_n = pl.cdiv(n, tn)
    grid_b = pl.cdiv(B, tb)
    # Channels outer, batch inner: the weights block index is constant across
    # the inner loop, so Pallas skips its re-DMA between consecutive steps.
    grid = (grid_n, grid_b)

    w_itemsize = jnp.dtype(weights.dtype).itemsize
    cost = pl.CostEstimate(
        flops=3 * B * n,
        transcendentals=grid_b * grid_n * tn,   # sigmoid recomputed per grid step
        bytes_accessed=3 * B * n * itemsize + 2 * n * w_itemsize,
    )

    return pl.pallas_call(
        lazy_layer_kernel,
        out_shape=jax.ShapeDtypeStruct((B, n), x.dtype),
        grid_spec=pltpu.PrefetchScalarGridSpec(
            num_scalar_prefetch=0,
            grid=grid,
            in_specs=[
                pl.BlockSpec((2, tn), lambda j, i: (0, j)),    # weights: channel slice
                pl.BlockSpec((tb, tn), lambda j, i: (i, j)),   # x tile
                pl.BlockSpec((tb, tn), lambda j, i: (i, j)),   # propagated tile
            ],
            out_specs=pl.BlockSpec((tb, tn), lambda j, i: (i, j)),
        ),
        compiler_params=pltpu.CompilerParams(
            dimension_semantics=("parallel", "parallel"),
            vmem_limit_bytes=vmem_limit,
        ),
        cost_estimate=cost,
    )(weights, x, propagated)


def lazy_layer_ref(x, propagated, weights):
    s = jax.nn.softmax(weights.astype(jnp.float32), axis=0)
    return (x.astype(jnp.float32) * s[0]
            + propagated.astype(jnp.float32) * s[1]).astype(x.dtype)


if __name__ == "__main__":
    B, n = 16, 256

    key = jax.random.PRNGKey(0)
    kx, kp, kw = jax.random.split(key, 3)
    x = jax.random.normal(kx, (B, n), dtype=jnp.float32)
    propagated = jax.random.normal(kp, (B, n), dtype=jnp.float32)
    # reset_parameters() would set ones; perturb so the softmax is non-trivial.
    weights = jnp.ones((2, n), dtype=jnp.float32) + 0.1 * jax.random.normal(
        kw, (2, n), dtype=jnp.float32
    )

    ref = lazy_layer_ref(x, propagated, weights)

    # Auto-tiled path (small array -> single tile split across channels so the
    # "parallel" grid has >= 2 steps).
    out = jax.block_until_ready(lazy_layer(x, propagated, weights))
    assert out.shape == (B, n)
    assert jnp.allclose(out, ref, atol=1e-5, rtol=1e-5), "mismatch vs reference (auto tiles)"

    # Explicit small tiles -> 2x2 grid, exercising the multi-step pipelined path.
    out2 = jax.block_until_ready(lazy_layer(x, propagated, weights, tb=8, tn=128))
    assert jnp.allclose(out2, ref, atol=1e-5, rtol=1e-5), "mismatch vs reference (2x2 grid)"

    # bf16 activations: kernel blends in f32 and only casts on the store.
    xb, pb = x.astype(jnp.bfloat16), propagated.astype(jnp.bfloat16)
    outb = jax.block_until_ready(lazy_layer(xb, pb, weights))
    refb = lazy_layer_ref(xb, pb, weights)
    assert outb.dtype == jnp.bfloat16
    assert jnp.allclose(outb.astype(jnp.float32), refb.astype(jnp.float32),
                        atol=2e-2, rtol=2e-2), "mismatch vs reference (bf16)"

    print("KERNEL_OK")
</pallas_src>

<mosaic_0001>
module attributes {stable_mosaic.version = 11 : i64} {
  func.func @lazy_layer_kernel(%arg0: i32, %arg1: i32, %arg2: memref<2x128xf32, #tpu.memory_space<vmem>>, %arg3: memref<16x128xf32, #tpu.memory_space<vmem>>, %arg4: memref<16x128xf32, #tpu.memory_space<vmem>>, %arg5: memref<16x128xf32, #tpu.memory_space<vmem>>) attributes {dimension_semantics = [#tpu.dimension_semantics<parallel>, #tpu.dimension_semantics<parallel>], iteration_bounds = array<i64: 2, 1>, scalar_prefetch = 0 : i64, scratch_operands = 0 : i64, tpu.core_type = #tpu.core_type<tc>, window_params = [{transform_indices = @transform_0, window_bounds = array<i64: 2, 128>}, {transform_indices = @transform_1, window_bounds = array<i64: 16, 128>}, {transform_indices = @transform_2, window_bounds = array<i64: 16, 128>}, {transform_indices = @transform_3, window_bounds = array<i64: 16, 128>}]} {
    %c0 = arith.constant 0 : index
    %c0_0 = arith.constant 0 : index
    %0 = vector.load %arg2[%c0, %c0_0] : memref<2x128xf32, #tpu.memory_space<vmem>>, vector<2x128xf32>
    %1 = vector.extract_strided_slice %0 {offsets = [0, 0], sizes = [1, 128], strides = [1, 1]} : vector<2x128xf32> to vector<1x128xf32>
    %2 = vector.extract_strided_slice %0 {offsets = [1, 0], sizes = [1, 128], strides = [1, 1]} : vector<2x128xf32> to vector<1x128xf32>
    %3 = arith.subf %1, %2 : vector<1x128xf32>
    %cst = arith.constant 0.000000e+00 : f32
    %4 = vector.broadcast %cst : f32 to vector<1x128xf32>
    %5 = arith.subf %4, %3 : vector<1x128xf32>
    %6 = math.exp %5 : vector<1x128xf32>
    %cst_1 = arith.constant 1.000000e+00 : f32
    %7 = vector.broadcast %cst_1 : f32 to vector<1x128xf32>
    %8 = arith.addf %7, %6 : vector<1x128xf32>
    %9 = tpu.reciprocal %8 : vector<1x128xf32> -> vector<1x128xf32>
    %c0_2 = arith.constant 0 : index
    %c0_3 = arith.constant 0 : index
    %10 = vector.load %arg3[%c0_2, %c0_3] : memref<16x128xf32, #tpu.memory_space<vmem>>, vector<16x128xf32>
    %c0_4 = arith.constant 0 : index
    %c0_5 = arith.constant 0 : index
    %11 = vector.load %arg4[%c0_4, %c0_5] : memref<16x128xf32, #tpu.memory_space<vmem>>, vector<16x128xf32>
    %12 = arith.subf %10, %11 : vector<16x128xf32>
    %13 = vector.broadcast %9 : vector<1x128xf32> to vector<16x128xf32>
    %14 = arith.mulf %13, %12 : vector<16x128xf32>
    %15 = arith.addf %11, %14 : vector<16x128xf32>
    %c0_6 = arith.constant 0 : index
    %c0_7 = arith.constant 0 : index
    %16 = vector.load %arg5[%c0_6, %c0_7] : memref<16x128xf32, #tpu.memory_space<vmem>>, vector<16x128xf32>
    tpu.vector_store %arg5[%c0_6, %c0_7], %15 {strides = array<i32>} : memref<16x128xf32, #tpu.memory_space<vmem>>, vector<16x128xf32>,
    return
  }
  func.func @transform_0(%arg0: i32, %arg1: i32) -> (i32, i32) {
    %c0_i32 = arith.constant 0 : i32
    %c0_i32_0 = arith.constant 0 : i32
    return %c0_i32, %arg0 : i32, i32
  }
  func.func @transform_1(%arg0: i32, %arg1: i32) -> (i32, i32) {
    %c0_i32 = arith.constant 0 : i32
    return %arg1, %arg0 : i32, i32
  }
  func.func @transform_2(%arg0: i32, %arg1: i32) -> (i32, i32) {
    %c0_i32 = arith.constant 0 : i32
    return %arg1, %arg0 : i32, i32
  }
  func.func @transform_3(%arg0: i32, %arg1: i32) -> (i32, i32) {
    %c0_i32 = arith.constant 0 : i32
    return %arg1, %arg0 : i32, i32
  }
}

</mosaic_0001>

<bundles_post_ra>
// kernel: tpu_custom_call.1
= control target key start
LH: loop header
LB: loop body
LE: loop exit
PB: predicated region body
PF: predicated region fallthrough
CT: control target
= control target key end

     0   :  { %s970_s0 = inlined_call_operand.hbm [shape: f32[2,256], index: 0, kind: input, shape index: {}]   ;;  %s971_s1 = inlined_call_operand.hbm [shape: f32[16,256], index: 1, kind: input, shape index: {}]   ;;  %s972_s2 = inlined_call_operand.hbm [shape: f32[16,256], index: 2, kind: input, shape index: {}]   ;;  %s973_s3 = inlined_call_operand.hbm [shape: f32[16,256], index: 3, kind: output, shape index: {}]  }
   0x1   :  { %978 = sst [smem:[#allocation14_spill]] %s971_s1 }
   0x2   :  { %8 = vsyncpa [#allocation3], 0 }
   0x3   :  { %10 = vsyncpa [#allocation3 + $0x1], 0 }
   0x4   :  { %11 = vsyncpa [#allocation6], 0 }
   0x5   :  { %13 = vsyncpa [#allocation6 + $0x1], 0 }
   0x6   :  { %14 = vsyncpa [#allocation4], 0 }
   0x7   :  { %16 = vsyncpa [#allocation4 + $0x1], 0  ;;  %s761_s12 = smov 0   ;;  %s763_s13 = smov 0  }
   0x8   :  { %s765_s14 = smov 0   ;;  %s767_s15 = smov 0  }
   0x9   :  { %s769_s16 = smov 0   ;;  %s771_s17 = smov 0  }
   0xa LB: > { %s792_s18 = sadd.s32 4294967295, %s729_s17   ;;  %s461_s19 = sadd.s32 4294967294, %s729_s17   ;;  %s729_s17 = sphi %s771_s17, %s22_s17   ;;  %s725_s16 = sphi %s769_s16, %s998_s16   ;;  %s721_s15 = sphi %s767_s15, %s997_s15   ;;  %s717_s14 = sphi %s765_s14, %s996_s14   ;;  %s713_s13 = sphi %s763_s13, %s995_s13   ;;  %s709_s12 = sphi %s761_s12, %s994_s12  }
   0xb   : > { %s34_s20 = sadd.s32 1, %s725_s16  ;;  %s41_s21 = sadd.s32 1, %s717_s14 }
   0xc   : > { %p36_p0 = scmp.ge.s32.totalorder %s34_s20, 2  ;;  %p48_p1 = scmp.ne.s32.totalorder %s717_s14, %s713_s13 }
   0xd   : > { %p49_p2 = scmp.eq.s32.totalorder %s729_s17, 0  ;;  %p54_p3 = scmp.ne.s32.totalorder %s713_s13, %s709_s12 }
   0xe   : > { %s1000_s20 = smov (%p36_p0, %s34_s20), 0  ;;  %p55_p5 = scmp.eq.s32.totalorder %s792_s18, 0 }
   0xf   : > { %979 = sst [smem:[#allocation12_spill]] %s1000_s20  ;;  %p804_p4 = por %p49_p2, %p48_p1 }
  0x10   : > { %s38_s23 = ssub.s32 %s725_s16, %s1000_s20  ;;  %p136_p6 = scmp.eq.s32.totalorder %s792_s18, 1 }
  0x11   : > { %p39_p7 = scmp.eq.s32.totalorder %s38_s23, 0  ;;  %p812_p8 = por %p55_p5, %p54_p3 }
  0x12   : > { %p816_p9 = por %p136_p6, %p48_p1  ;;  %p142_p10 = scmp.eq.s32.totalorder %s461_s19, 1 }
  0x13   : > { %s821_s26 = scalar_select %p39_p7, %s717_s14, %s41_s21  }
  0x14   : > { %p823_p11 = por %p142_p10, %p54_p3  ;;  %p501_p13 = scmp.lt.s32.totalorder %s729_s17, 2 }
  0x15   : > { %983 = sst [smem:[#allocation13_spill]] %s821_s26  ;;  %s830_s28 = sand.u32 1, %s717_s14  }
  0x16   : > { %s180_s29 = sand.u32 1, %s729_s17   ;;  %s466_s30 = sshll.u32 %s830_s28, 4 }
  0x17   : > { %p836_p0 = pnand %p501_p13, %p804_p4  ;;  %s467_s5 = sshll.u32 %s725_s16, 7 }
  0x18   : > { %s986_s1 = sld [smem:[#allocation14_spill]]  ;;  %s184_s9 = scalar_lea.vmem [#allocation5], %s466_s30 }
  0x19   : > { %s193_s10 = sshll.u32 %s184_s9, 4  ;;  %s846_s11 = scalar_lea.sflag [#allocation6], %s180_s29  ;;  %s194_s10 = int_to_ptr.vmem [resolvable:$true] %s193_s10 }
  0x1a   : > { %p563_p1 = pneg %p836_p0  ;;  %s574_s19 = scalar_lea.vmem %s194_s10, 256 }
  0x1b   : > { %p575_p2 = scmp.ne.s32.totalorder %s194_s10, %s574_s19  ;;  %s731_s21 = smov [#allocation5]  }
  0x1c   : > { %s579_s22 = sshll.u32 %s731_s21, 4  ;;  %s580_s22 = int_to_ptr.vmem [resolvable:$false] %s579_s22 }
  0x1d   : > { %p577_p3 = pnand %p575_p2, %p563_p1  ;;  %s581_s23 = scalar_lea.vmem %s580_s22, 512 }
  0x1e   : > { %s192_s8 = scalar_lea.hbm %s986_s1, %s467_s5  ;;  %p582_p5 = scmp.lt.s32.totalorder %s194_s10, %s580_s22 }
  0x1f   : > { %p578_p4 = pneg %p577_p3  ;;  %p583_p6 = scmp.lt.s32.totalorder %s581_s23, %s574_s19 }
  0x21   : > { %p584_p7 = por %p583_p6, %p582_p5 }
  0x23   : > { %p585_p10 = pnand %p584_p7, %p578_p4 }
  0x25   : > { %588 = shalt.err (!%p585_p10)
}
  0x26   : > { %s975_s6 = smov 256   ;;  %s976_s29 = smov 128  }
  0x27   : > { %s977_s7 = smov 8   ;;  %s862_s21 = scalar_lea.hbm %s972_s2, %s467_s5 }
  0x28   : > { %493 = dma.hbm_to_vmem [thread:$0]  (!%p836_p0), %s192_s8, 256, %s194_s10, %s846_s11, %s975_s6, %s976_s29, %s977_s7  }
  0x29   : > { %s207_s22 = scalar_lea.vmem [#allocation7], %s466_s30  ;;  %p470_p13 = scmp.ge.s32.totalorder %s729_s17, 1 }
  0x2a   : > { %s216_s23 = sshll.u32 %s207_s22, 4  ;;  %p224_p2 = scmp.lt.s32.totalorder %s729_s17, 3  ;;  %s866_s23 = int_to_ptr.vmem [resolvable:$true] %s216_s23 }
  0x2b   : > { %s464_s20 = sshll.u32 %s830_s28, 1  ;;  %s465_s26 = sshll.u32 %s725_s16, 5 }
  0x2c   : > { %p870_p3 = pnand %p470_p13, %p224_p2  ;;  %s171_s9 = scalar_lea.hbm %s970_s0, %s465_s26 }
  0x2d   : > { %s166_s5 = scalar_lea.vmem [#allocation2], %s464_s20  ;;  %s163_s6 = scalar_lea.sflag [#allocation3], %s830_s28 }
  0x2e   : > { %s173_s19 = sshll.u32 %s166_s5, 4  ;;  %s735_s22 = smov [#allocation2]   ;;  %s174_s19 = int_to_ptr.vmem [resolvable:$true] %s173_s19 }
  0x2f   : > { %s602_s30 = scalar_lea.vmem %s174_s19, 32  ;;  %s607_s29 = sshll.u32 %s735_s22, 4  ;;  %s608_s29 = int_to_ptr.vmem [resolvable:$false] %s607_s29 }
  0x30   : > { %p603_p4 = scmp.ne.s32.totalorder %s174_s19, %s602_s30  ;;  %s609_s7 = scalar_lea.vmem %s608_s29, 64 }
  0x31   : > { %p610_p7 = scmp.lt.s32.totalorder %s174_s19, %s608_s29  ;;  %p611_p10 = scmp.lt.s32.totalorder %s609_s7, %s602_s30 }
  0x32   : > { %p605_p5 = pnand %p603_p4, %p563_p1 }
  0x33   : > { %p612_p13 = por %p611_p10, %p610_p7 }
  0x34   : > { %p606_p6 = pneg %p605_p5 }
  0x36   : > { %p613_p2 = pnand %p612_p13, %p606_p6 }
  0x38   : > { %616 = shalt.err (!%p613_p2)
}
  0x39   : > { %490 = dma.hbm_to_vmem [thread:$0]  (!%p836_p0), %s171_s9, 32, %s174_s19, %s163_s6  }
  0x3a   : > { %s630_s20 = scalar_lea.vmem %s866_s23, 256  ;;  %s736_s26 = smov [#allocation7]  }
  0x3b   : > { %p631_p12 = scmp.ne.s32.totalorder %s866_s23, %s630_s20  ;;  %s635_s28 = sshll.u32 %s736_s26, 4  ;;  %s636_s28 = int_to_ptr.vmem [resolvable:$false] %s635_s28 }
  0x3c   : > { %s637_s29 = scalar_lea.vmem %s636_s28, 512  ;;  %p638_p7 = scmp.lt.s32.totalorder %s866_s23, %s636_s28 }
  0x3d   : > { %p633_p4 = pnand %p631_p12, %p563_p1  ;;  %p639_p6 = scmp.lt.s32.totalorder %s637_s29, %s630_s20 }
  0x3f   : > { %p634_p5 = pneg %p633_p4  ;;  %p640_p10 = por %p639_p6, %p638_p7 }
  0x41   : > { %p641_p13 = pnand %p640_p10, %p634_p5 }
  0x43   : > { %644 = shalt.err (!%p641_p13)
}
  0x44   : > { %s988_s7 = smov 8   ;;  %s989_s8 = smov 128  }
  0x45   : > { %s990_s6 = smov 256   ;;  %228 = sbr.rel (%p870_p3) target bundleno = 138 (0x8a), region = 32 }
  0x46   : > { %496 = dma.hbm_to_vmem [thread:$0]  (!%p836_p0), %s862_s21, 256, %s866_s23, %s846_s11, %s990_s6, %s989_s8, %s988_s7  }
  0x47   : > { %s902_s10 = sand.u32 (!%p870_p3), 1, %s713_s13  }
  0x48   : > { %s471_s9 = sshll.u32 (!%p870_p3), %s902_s10, 1  ;;  %s231_s5 = scalar_lea.sflag (!%p870_p3), [#allocation3], %s902_s10 }
  0x49   : > { %s234_s19 = scalar_lea.vmem (!%p870_p3), [#allocation2], %s471_s9 }
  0x4a   : > { %696 = dma.done.wait (%p812_p8), %s231_s5, 32  }
  0x4b   : > { %698 = vsyncadd (%p812_p8), %s231_s5, 4294967264  ;;  %s239_s4 = sand.u32 1, %s792_s18   ;;  %s472_s1 = sshll.u32 %s902_s10, 4 }
  0x4c   : > { %s240_s11 = scalar_lea.sflag [#allocation6], %s239_s4  ;;  %s243_s21 = scalar_lea.vmem [#allocation5], %s472_s1 }
  0x4d   : > { %700 = dma.done.wait (%p812_p8), %s240_s11, 512  }
  0x4e   : > { %702 = vsyncadd (%p812_p8), %s240_s11, 4294966784  ;;  %v288_v0 = vld [vmem:[%s234_s19] sm:$0x3]  ;;  %v304_v7 = vlaneseq  ;;  %v298_v9 = vld [vmem:[%s243_s21] sm:$0xff]  ;;  %s252_s18 = scalar_lea.vmem [#allocation7], %s472_s1  ;;  %s284_s24 = scalar_lea.vmem [#allocation8], %s472_s1 }
  0x4f   : > { %v290_v1 = vrot.slane %v288_v0, 1  ;;  %v300_v10 = vld [vmem:[%s252_s18] sm:$0xff]  ;;  %v299_v11 = vld [vmem:[%s243_s21 + $0x8] sm:$0xff]  ;;  %s330_s23 = sshll.u32 %s284_s24, 4  ;;  %s476_s30 = sshll.u32 %s721_s15, 7  ;;  %s917_s23 = int_to_ptr.vmem [resolvable:$true] %s330_s23 }
  0x50   : > { %v305_v8 = vshrl.u32 %v304_v7, 7  ;;  %v301_v12 = vld [vmem:[%s252_s18 + $0x8] sm:$0xff]  ;;  %v302_v14 = vsub.f32 %v298_v9, %v300_v10  ;;  %s922_s26 = scalar_lea.hbm %s973_s3, %s476_s30  ;;  %s315_s28 = scalar_lea.sflag [#allocation4], %s902_s10 }
  0x51   : > { %v292_v2 = vsub.f32 %v288_v0, %v290_v1  ;;  %v303_v15 = vsub.f32 %v299_v11, %v301_v12  ;;  %s645_s29 = scalar_lea.vmem %s917_s23, 256  ;;  %s737_s15 = smov [#allocation8]  }
  0x52   : > { %v306_v13 = vsub.s32 0, %v305_v8  ;;  %p646_p8 = scmp.ne.s32.totalorder %s917_s23, %s645_s29  ;;  %s649_s7 = sshll.u32 %s737_s15, 4  ;;  %s650_s7 = int_to_ptr.vmem [resolvable:$false] %s649_s7 }
  0x53   : > { %v293_v3 = vsub.f32 0.0, %v292_v2  ;;  %s651_s8 = scalar_lea.vmem %s650_s7, 512  ;;  %p652_p1 = scmp.lt.s32.totalorder %s917_s23, %s650_s7 }
  0x54   : > { %p647_p12 = pnand %p646_p8, %p816_p9  ;;  %p653_p3 = scmp.lt.s32.totalorder %s651_s8, %s645_s29 }
  0x55   : > { %v294_v4 = vmul.f32 1.442695, %v293_v3 }
  0x56   : > { %p648_p0 = pneg %p647_p12  ;;  %p654_p2 = por %p653_p3, %p652_p1 }
  0x57   : > { %557 = vpow2.f32 %v294_v4 }
  0x58   : > { %p655_p4 = pnand %p654_p2, %p648_p0 }
  0x64   : > { %v558_v5 = vpop.eup %557 }
  0x65   : > { %v296_v6 = vadd.f32 1.0, %v558_v5 }
  0x67   : > { %559 = vrcp.f32 %v296_v6 }
  0x74   : > { %v560_v16 = vpop.eup %559 }
  0x75   : > { %v307_v17 = vrot.slane %v560_v16, %v306_v13 }
  0x77   : > { %v308_v18 = vmul.f32 %v307_v17, %v302_v14  ;;  %v309_v19 = vmul.f32 %v307_v17, %v303_v15 }
  0x79   : > { %v310_v20 = vadd.f32 %v308_v18, %v300_v10  ;;  %v311_v21 = vadd.f32 %v309_v19, %v301_v12 }
  0x7b   : > { %312 = vst [vmem:[%s284_s24] sm:$0xff] %v310_v20  ;;  %313 = vst [vmem:[%s284_s24 + $0x8] sm:$0xff] %v311_v21 }
  0x7c   : > { %658 = shalt.err (!%p655_p4)
}
  0x7d   : > { %s659_s6 = scalar_lea.hbm %s922_s26, 256  ;;  %s663_s19 = scalar_lea.hbm %s973_s3, 512 }
  0x7e   : > { %p660_p5 = scmp.ne.s32.totalorder %s922_s26, %s659_s6  ;;  %p664_p10 = scmp.lt.s32.totalorder %s922_s26, %s973_s3 }
  0x7f   : > { %p665_p13 = scmp.lt.s32.totalorder %s663_s19, %s659_s6 }
  0x80   : > { %p661_p7 = pnand %p660_p5, %p816_p9 }
  0x81   : > { %p666_p8 = por %p665_p13, %p664_p10 }
  0x82   : > { %p662_p6 = pneg %p661_p7 }
  0x84   : > { %p667_p12 = pnand %p666_p8, %p662_p6 }
  0x86   : > { %670 = shalt.err (!%p667_p12)
}
  0x87   : > { %s738_s11 = smov 128   ;;  %s739_s21 = smov 256  }
  0x88   : > { %s740_s18 = smov 8  }
  0x89   : > { %485 = dma.vmem_to_hbm [thread:$0]  (%p816_p9), %s917_s23, 256, %s922_s26, %s315_s28, %s738_s11, %s739_s21, %s740_s18  }
  0x8a PF: > { %s345_s24 = sand.u32 1, %s709_s12   ;;  %p991_p0 = scmp.ge.s32.totalorder %s729_s17, 2 }
  0x8b   : > { %s346_s30 = scalar_lea.sflag [#allocation4], %s345_s24 }
  0x8c   : > { %p498_p1 = pnand %p991_p0, %p823_p11 }
  0x8e   : > { %p499_p3 = pneg %p498_p1 }
  0x90   : > { %704 = dma.done.wait (%p499_p3), %s346_s30, 256  }
  0x91   : > { %706 = vsyncadd (%p499_p3), %s346_s30, 4294967040  ;;  %s22_s17 = sadd.s32 1, %s729_s17   ;;  %s992_s25 = sld [smem:[#allocation13_spill]] }
  0x92   : > { %p19_p2 = scmp.ge.s32.totalorder %s22_s17, 4   ;;  %s993_s10 = sld [smem:[#allocation12_spill]] }
  0x93   : > { %s994_s12 = smov %s713_s13  ;;  %s995_s13 = smov %s717_s14 }
  0x94   : > { %s997_s15 = smov %s725_s16  ;;  %21 = sbr.rel (!%p19_p2) target bundleno = 10 (0xa), region = 101 }
  0x97   : > { %s996_s14 = smov %s992_s25 }
  0x98   : > { %s998_s16 = smov %s993_s10 }
  0x99   :  { %351 = vsyncpa [#allocation3], 1 }
  0x9a   :  { %353 = vsyncpa [#allocation3 + $0x1], 1 }
  0x9b   :  { %354 = vsyncpa [#allocation6], 1 }
  0x9c   :  { %356 = vsyncpa [#allocation6 + $0x1], 1 }
  0x9d   :  { %357 = vsyncpa [#allocation4], 1 }
  0x9e   :  { %359 = vsyncpa [#allocation4 + $0x1], 1 }

</bundles_post_ra>
